<compile_context>
chip_gen: v7x
topology: tpu7x:2x2x1
jax: 0.10.0
libtpu: 0.0.40
codegen_flags: <defaults>
</compile_context>

<pallas_src>
import functools

import jax
import jax.numpy as jnp
from jax.experimental import pallas as pl
from jax.experimental.pallas import tpu as pltpu


# Conservative budgets so the same kernel works on v5e/v6e (128 MiB VMEM) and
# v7x (64 MiB VMEM per TensorCore).
_VMEM_INPUT_BUDGET = 24 * 1024 * 1024   # bytes for the double-buffered input tiles
_VMEM_LIMIT_BYTES = 48 * 1024 * 1024    # scoped VMEM limit handed to Mosaic


def _accumulate(mean, var, y, acc_ref, *, row_tile, n_rows, needs_mask):
    """Add this tile's contribution (unscaled) into the VMEM vector accumulator."""
    diff = y - mean
    # Exact division kept for parity with the PyTorch reference; swap the division
    # for `diff * diff * pl.reciprocal(var, approx=True)` to move it onto the EUP
    # slot if ~1e-3 relative deviation is acceptable.
    contrib = jnp.log(var) + diff * diff / var            # (row_tile, d_blk) f32
    if needs_mask:
        # Last tile may run past N rows; mask the out-of-bounds rows to zero.
        i = pl.program_id(0)
        row_ids = jax.lax.broadcasted_iota(jnp.int32, (row_tile, 1), 0) + i * row_tile
        contrib = jnp.where(row_ids < n_rows, contrib, 0.0)
    # Row reduction in groups of 8 is pure vreg adds (VPU only, no XLU, no SMEM
    # scalar dependency chain).  The single cross-lane reduce happens in _finalize.
    acc_ref[...] += contrib.reshape(row_tile // 8, 8, contrib.shape[-1]).sum(axis=0)


def _finalize(out_ref, acc_ref, *, inv_scale):
    # One 2D -> scalar reduce and one scalar multiply, done exactly once.
    out_ref[0, 0] = jnp.sum(acc_ref[...]) * inv_scale


def _gaussian_loss_kernel_split(mean_ref, var_ref, y_ref, out_ref, acc_ref, *,
                                row_tile, n_rows, needs_mask, inv_scale):
    """Used when D % 128 == 0: mean/variance delivered as separate lane-aligned tiles."""
    i = pl.program_id(0)

    @pl.when(i == 0)
    def _():
        acc_ref[...] = jnp.zeros_like(acc_ref)

    _accumulate(mean_ref[...].astype(jnp.float32),
                var_ref[...].astype(jnp.float32),
                y_ref[...].astype(jnp.float32),
                acc_ref, row_tile=row_tile, n_rows=n_rows, needs_mask=needs_mask)

    @pl.when(i == pl.num_programs(0) - 1)
    def _():
        _finalize(out_ref, acc_ref, inv_scale=inv_scale)


def _gaussian_loss_kernel_fused(yhat_ref, y_ref, out_ref, acc_ref, *,
                                dim, row_tile, n_rows, needs_mask, inv_scale):
    """Fallback when D is not a multiple of 128: slice mean/variance in-kernel."""
    i = pl.program_id(0)

    @pl.when(i == 0)
    def _():
        acc_ref[...] = jnp.zeros_like(acc_ref)

    yhat = yhat_ref[...].astype(jnp.float32)
    _accumulate(yhat[:, :dim], yhat[:, dim:],
                y_ref[...].astype(jnp.float32),
                acc_ref, row_tile=row_tile, n_rows=n_rows, needs_mask=needs_mask)

    @pl.when(i == pl.num_programs(0) - 1)
    def _():
        _finalize(out_ref, acc_ref, inv_scale=inv_scale)


def _pick_row_tile(n: int, dim: int, itemsize: int) -> int:
    """Biggest row tile whose double-buffered inputs fit the VMEM budget."""
    bytes_per_row = 3 * dim * itemsize                 # yhat (2D) + y (D)
    budget_rows = _VMEM_INPUT_BUDGET // (2 * bytes_per_row)  # x2: double buffering
    row_tile = min(int(budget_rows), 1024, max(n, 8))  # 512-1024 rows is the sweet spot
    return max(8, (row_tile // 8) * 8)                 # f32 sublane multiple


def gaussian_loss(yhat: jax.Array, y: jax.Array, *, row_tile: int | None = None) -> jax.Array:
    """Pallas TPU implementation of GaussianLoss.forward(yhat, y) -> scalar."""
    n, two_d = yhat.shape
    dim = two_d // 2
    assert two_d == 2 * dim, f"yhat must have an even number of columns, got {two_d}"
    assert y.shape == (n, dim), f"y shape {y.shape} incompatible with yhat {yhat.shape}"

    if row_tile is None:
        row_tile = _pick_row_tile(n, dim, jnp.dtype(yhat.dtype).itemsize)
    assert row_tile % 8 == 0 and row_tile >= 8, "row_tile must be a positive multiple of 8"

    num_steps = -(-n // row_tile)                      # cdiv; last block masked if partial
    needs_mask = (num_steps * row_tile) != n
    inv_scale = 0.5 / float(n * dim)                   # the /2 and the mean, applied once

    common = dict(row_tile=row_tile, n_rows=n, needs_mask=needs_mask, inv_scale=inv_scale)

    if dim % 128 == 0:
        # Lane-aligned D: let the DMA deliver mean and variance as two separate tiles
        # of yhat (column block 0 and 1) — no in-kernel slicing / lane shuffles.
        kernel = functools.partial(_gaussian_loss_kernel_split, **common)
        in_specs = [
            pl.BlockSpec((row_tile, dim), lambda i: (i, 0)),   # means     yhat[:, :dim]
            pl.BlockSpec((row_tile, dim), lambda i: (i, 1)),   # variances yhat[:, dim:]
            pl.BlockSpec((row_tile, dim), lambda i: (i, 0)),   # y
        ]
        operands = (yhat, yhat, y)
    else:
        # Small / unaligned D: take the full (row_tile, 2D) block and slice in-kernel.
        kernel = functools.partial(_gaussian_loss_kernel_fused, dim=dim, **common)
        in_specs = [
            pl.BlockSpec((row_tile, 2 * dim), lambda i: (i, 0)),
            pl.BlockSpec((row_tile, dim), lambda i: (i, 0)),
        ]
        operands = (yhat, y)

    # NOTE: on v7x the row axis could additionally be sharded across the two
    # TensorCores (parallel outer grid axis + per-partition partial sums); kept
    # single-axis here since v5e/v6e have one TC and the kernel is HBM-bound.
    out = pl.pallas_call(
        kernel,
        out_shape=jax.ShapeDtypeStruct((1, 1), jnp.float32),
        grid_spec=pltpu.PrefetchScalarGridSpec(
            num_scalar_prefetch=0,
            grid=(num_steps,),
            in_specs=in_specs,
            out_specs=pl.BlockSpec(memory_space=pltpu.SMEM),
            scratch_shapes=[pltpu.VMEM((8, dim), jnp.float32)],   # vector accumulator
        ),
        compiler_params=pltpu.CompilerParams(
            dimension_semantics=("arbitrary",),        # sequential reduction over row tiles
            vmem_limit_bytes=_VMEM_LIMIT_BYTES,
        ),
    )(*operands)
    return out[0, 0]


def _reference(yhat, y):
    dim = yhat.shape[1] // 2
    mean = yhat[:, :dim]
    variance = yhat[:, dim:]
    term1 = jnp.log(variance) / 2.0
    term2 = (y - mean) ** 2 / (variance * 2.0)
    return jnp.mean(term1 + term2)


if __name__ == "__main__":
    key = jax.random.PRNGKey(0)

    def make_inputs(k, n, d):
        k_mean, k_var, k_y = jax.random.split(k, 3)
        means = jax.random.normal(k_mean, (n, d), dtype=jnp.float32)
        # positive variances, bounded away from zero (as the module recommends)
        variances = 1e-3 + jax.nn.softplus(jax.random.normal(k_var, (n, d), dtype=jnp.float32))
        yhat = jnp.concatenate([means, variances], axis=1)   # (n, 2d)
        y = jax.random.normal(k_y, (n, d), dtype=jnp.float32)
        return yhat, y

    # (n, d, row_tile): exercises the fused path, the lane-aligned split path,
    # multi-step accumulation, and the masked partial last tile.
    cases = [
        (8, 16, None),    # tiny demo shape: fused path, single block
        (32, 16, 8),      # fused path, 4 grid steps
        (16, 128, None),  # lane-aligned D: BlockSpec-level mean/variance split
        (40, 128, 16),    # split path, 3 steps, masked partial last tile
        (20, 16, 8),      # fused path, masked partial last tile
    ]
    keys = jax.random.split(key, len(cases))
    for (n, d, rt), k in zip(cases, keys):
        yhat, y = make_inputs(k, n, d)
        loss = jax.block_until_ready(gaussian_loss(yhat, y, row_tile=rt))
        ref = jax.block_until_ready(_reference(yhat, y))
        assert jnp.allclose(loss, ref, rtol=1e-5, atol=1e-5), (n, d, rt, loss, ref)

    print("KERNEL_OK")
</pallas_src>

<mosaic_0001>
module attributes {stable_mosaic.version = 11 : i64} {
  func.func @_gaussian_loss_kernel_fused(%arg0: i32, %arg1: memref<8x32xf32, #tpu.memory_space<vmem>>, %arg2: memref<8x16xf32, #tpu.memory_space<vmem>>, %arg3: memref<1x1xf32, #tpu.memory_space<smem>>, %arg4: memref<8x16xf32, #tpu.memory_space<vmem>>) attributes {dimension_semantics = [#tpu.dimension_semantics<arbitrary>], iteration_bounds = array<i64: 1>, scalar_prefetch = 0 : i64, scratch_operands = 1 : i64, tpu.core_type = #tpu.core_type<tc>, window_params = [{transform_indices = @transform_0, window_bounds = array<i64: 8, 32>}, {transform_indices = @transform_1, window_bounds = array<i64: 8, 16>}, {transform_indices = @transform_2, window_bounds = array<i64: 1, 1>}]} {
    %c0_i32 = arith.constant 0 : i32
    %0 = arith.cmpi eq, %arg0, %c0_i32 : i32
    %1 = arith.extui %0 : i1 to i32
    %c0_i32_0 = arith.constant 0 : i32
    %2 = arith.cmpi ne, %1, %c0_i32_0 : i32
    scf.if %2 {
      %cst_10 = arith.constant 0.000000e+00 : f32
      %20 = vector.broadcast %cst_10 : f32 to vector<8x16xf32>
      %c0_11 = arith.constant 0 : index
      %c0_12 = arith.constant 0 : index
      %21 = vector.load %arg4[%c0_11, %c0_12] : memref<8x16xf32, #tpu.memory_space<vmem>>, vector<8x16xf32>
      tpu.vector_store %arg4[%c0_11, %c0_12], %20 {strides = array<i32>} : memref<8x16xf32, #tpu.memory_space<vmem>>, vector<8x16xf32>,
    } else {
    }
    %c0 = arith.constant 0 : index
    %c0_1 = arith.constant 0 : index
    %3 = vector.load %arg1[%c0, %c0_1] : memref<8x32xf32, #tpu.memory_space<vmem>>, vector<8x32xf32>
    %4 = vector.extract_strided_slice %3 {offsets = [0, 0], sizes = [8, 16], strides = [1, 1]} : vector<8x32xf32> to vector<8x16xf32>
    %5 = vector.extract_strided_slice %3 {offsets = [0, 16], sizes = [8, 16], strides = [1, 1]} : vector<8x32xf32> to vector<8x16xf32>
    %c0_2 = arith.constant 0 : index
    %c0_3 = arith.constant 0 : index
    %6 = vector.load %arg2[%c0_2, %c0_3] : memref<8x16xf32, #tpu.memory_space<vmem>>, vector<8x16xf32>
    %7 = arith.subf %6, %4 : vector<8x16xf32>
    %8 = math.log %5 : vector<8x16xf32>
    %9 = arith.mulf %7, %7 : vector<8x16xf32>
    %10 = arith.divf %9, %5 : vector<8x16xf32>
    %11 = arith.addf %8, %10 : vector<8x16xf32>
    %c0_4 = arith.constant 0 : index
    %c0_5 = arith.constant 0 : index
    %12 = vector.load %arg4[%c0_4, %c0_5] : memref<8x16xf32, #tpu.memory_space<vmem>>, vector<8x16xf32>
    %13 = vector.shape_cast %11 : vector<8x16xf32> to vector<1x8x16xf32>
    %cst = arith.constant dense<0.000000e+00> : vector<8x16xf32>
    %14 = vector.multi_reduction <add>, %13, %cst [0] : vector<1x8x16xf32> to vector<8x16xf32>
    %15 = arith.addf %12, %14 : vector<8x16xf32>
    %c0_6 = arith.constant 0 : index
    %c0_7 = arith.constant 0 : index
    %16 = vector.load %arg4[%c0_6, %c0_7] : memref<8x16xf32, #tpu.memory_space<vmem>>, vector<8x16xf32>
    tpu.vector_store %arg4[%c0_6, %c0_7], %15 {strides = array<i32>} : memref<8x16xf32, #tpu.memory_space<vmem>>, vector<8x16xf32>,
    %c0_i32_8 = arith.constant 0 : i32
    %17 = arith.cmpi eq, %arg0, %c0_i32_8 : i32
    %18 = arith.extui %17 : i1 to i32
    %c0_i32_9 = arith.constant 0 : i32
    %19 = arith.cmpi ne, %18, %c0_i32_9 : i32
    scf.if %19 {
      %c0_10 = arith.constant 0 : index
      %c0_11 = arith.constant 0 : index
      %20 = vector.load %arg4[%c0_10, %c0_11] : memref<8x16xf32, #tpu.memory_space<vmem>>, vector<8x16xf32>
      %21 = vector.shape_cast %20 : vector<8x16xf32> to vector<1x8x16xf32>
      %cst_12 = arith.constant dense<0.000000e+00> : vector<1xf32>
      %22 = vector.multi_reduction <add>, %21, %cst_12 [1, 2] : vector<1x8x16xf32> to vector<1xf32>
      %23 = vector.shape_cast %22 : vector<1xf32> to vector<1x1x1xf32>
      %24 = vector.extract %23[0, 0, 0] : f32 from vector<1x1x1xf32>
      %cst_13 = arith.constant 3.906250e-03 : f32
      %25 = arith.mulf %24, %cst_13 : f32
      %c0_14 = arith.constant 0 : index
      %c0_15 = arith.constant 0 : index
      %26 = memref.load %arg3[%c0_14, %c0_15] : memref<1x1xf32, #tpu.memory_space<smem>>
      memref.store %25, %arg3[%c0_14, %c0_15] : memref<1x1xf32, #tpu.memory_space<smem>>
    } else {
    }
    return
  }
  func.func @transform_0(%arg0: i32) -> (i32, i32) {
    %c0_i32 = arith.constant 0 : i32
    %c0_i32_0 = arith.constant 0 : i32
    return %arg0, %c0_i32 : i32, i32
  }
  func.func @transform_1(%arg0: i32) -> (i32, i32) {
    %c0_i32 = arith.constant 0 : i32
    %c0_i32_0 = arith.constant 0 : i32
    return %arg0, %c0_i32 : i32, i32
  }
  func.func @transform_2(%arg0: i32) -> (i32, i32) {
    %c0_i32 = arith.constant 0 : i32
    %c0_i32_0 = arith.constant 0 : i32
    %c0_i32_1 = arith.constant 0 : i32
    return %c0_i32, %c0_i32_0 : i32, i32
  }
}

</mosaic_0001>

<bundles_post_ra>
// kernel: tpu_custom_call.1
= control target key start
LH: loop header
LB: loop body
LE: loop exit
PB: predicated region body
PF: predicated region fallthrough
CT: control target
= control target key end

     0   :  { %7 = vsyncpa [#allocation4], 0  ;;  %s232_s0 = inlined_call_operand.hbm [shape: f32[8,32], index: 0, kind: input, shape index: {}]   ;;  %s233_s1 = inlined_call_operand.hbm [shape: f32[8,16], index: 1, kind: input, shape index: {}]   ;;  %s234_s2 = inlined_call_operand.hbm [shape: f32[1,1], index: 2, kind: output, shape index: {}]  }
   0x1   :  { %8 = vsyncpa [#allocation7], 0 }
   0x2   :  { %9 = vsyncpa [#allocation5], 0  ;;  %s172_s9 = smov [#allocation3]   ;;  %s173_s11 = smov [#allocation6]  }
   0x3   :  { %s16_s10 = sshll.u32 %s172_s9, 4  ;;  %s26_s12 = sshll.u32 %s173_s11, 4  ;;  %s17_s10 = int_to_ptr.vmem [resolvable:$true] %s16_s10  ;;  %s27_s12 = int_to_ptr.vmem [resolvable:$true] %s26_s12 }
   0x4   :  { %s112_s15 = scalar_lea.hbm %s232_s0, 128 }
   0x5   :  { %p113_p0 = scmp.ne.s32.totalorder %s232_s0, %s112_s15  ;;  %p116_p1 = scmp.lt.u32.totalorder %s112_s15, %s232_s0 }
   0x7   :  { %p118_p2 = pnand %p116_p1, %p113_p0 }
   0x9   :  { %121 = shalt.err (!%p118_p2)
}
   0xa   :  { %s122_s20 = scalar_lea.vmem %s17_s10, 128  ;;  %p127_p4 = scmp.lt.s32.totalorder %s17_s10, %s17_s10 }
   0xb   :  { %p123_p3 = scmp.ne.s32.totalorder %s17_s10, %s122_s20  ;;  %p128_p5 = scmp.lt.s32.totalorder %s122_s20, %s122_s20 }
   0xd   :  { %p129_p6 = por %p128_p5, %p127_p4 }
   0xf   :  { %p130_p7 = pnand %p129_p6, %p123_p3 }
  0x11   :  { %133 = shalt.err (!%p130_p7)
}
  0x12   :  { %19 = dma.hbm_to_vmem [thread:$0]  %s232_s0, 128, %s17_s10, [#allocation4]  }
  0x13   :  { %s134_s25 = scalar_lea.hbm %s233_s1, 128 }
  0x14   :  { %p135_p8 = scmp.ne.s32.totalorder %s233_s1, %s134_s25  ;;  %p138_p9 = scmp.lt.u32.totalorder %s134_s25, %s233_s1 }
  0x16   :  { %p140_p10 = pnand %p138_p9, %p135_p8 }
  0x18   :  { %143 = shalt.err (!%p140_p10)
}
  0x19   :  { %s144_s30 = scalar_lea.vmem %s27_s12, 128  ;;  %p149_p12 = scmp.lt.s32.totalorder %s27_s12, %s27_s12 }
  0x1a   :  { %p145_p11 = scmp.ne.s32.totalorder %s27_s12, %s144_s30  ;;  %p150_p13 = scmp.lt.s32.totalorder %s144_s30, %s144_s30 }
  0x1c   :  { %p151_p0 = por %p150_p13, %p149_p12 }
  0x1e   :  { %p152_p1 = pnand %p151_p0, %p145_p11 }
  0x20   :  { %155 = shalt.err (!%p152_p1)
}
  0x21   :  { %29 = dma.hbm_to_vmem [thread:$0]  %s233_s1, 128, %s27_s12, [#allocation7]  }
  0x22   :  { %166 = dma.done.wait [#allocation4], 128  }
  0x23   :  { %167 = vsyncadd [#allocation4], 4294967168 }
  0x24   :  { %168 = dma.done.wait [#allocation7], 128  }
  0x25   :  { %169 = vsyncadd [#allocation7], 4294967168  ;;  %v42_v0 = vld [vmem:[#allocation3] sm:$0xff]  ;;  %s174_s4 = smov 112   ;;  %v43_v2 = vld [vmem:[#allocation6] sm:$0xff]  ;;  %vm40_vm0 = vcmask 130048  }
  0x26   :  { %49 = vrot.lane.b32.xlu0 %v42_v0, %s174_s4  ;;  %v44_v3 = vsub.f32 %v43_v2, %v42_v0  ;;  %v175_v4 = vmov 0.0   ;;  %s176_s5 = smov 16   ;;  %s156_s9 = scalar_lea.hbm %s234_s2, 16 }
  0x27   :  { %41 = vst.msk [vmem:[#allocation2] sm:$0xff] %vm40_vm0, %v175_v4  ;;  %p157_p2 = scmp.ne.s32.totalorder %s234_s2, %s156_s9  ;;  %p160_p3 = scmp.lt.u32.totalorder %s156_s9, %s234_s2 }
  0x28   :  { %v47_v5 = vmul.f32 %v44_v3, %v44_v3 }
  0x29   :  { %p162_p4 = pnand %p160_p3, %p157_p2 }
  0x2e   :  { %v59_v12 = vld [vmem:[#allocation2] sm:$0xff] }
  0x98   :  { %v50_v1 = vpop.permute.xlu0 %49 }
  0x99   :  { %108 = vrcp.f32 %v50_v1 }
  0x9a   :  { %110 = vlog2.f32 %v42_v0 }
  0xa3   :  { %v109_v6 = vpop.eup %108 }
  0xa4   :  { %v53_v7 = vmul.f32 %v109_v6, %v47_v5  ;;  %v111_v8 = vpop.eup %110 }
  0xa5   :  { %v46_v9 = vmul.f32 0.6931472, %v111_v8 }
  0xa6   :  { %55 = vrot.lane.b32.xlu0 %v53_v7, %s176_s5 }
 0x118   :  { %v56_v10 = vpop.permute.xlu0 %55 }
 0x119   :  { %v58_v11 = vadd.f32 %v56_v10, %v46_v9 }
 0x11b   :  { %62 = vrot.lane.b32.xlu1 %v58_v11, %s174_s4 }
 0x18d   :  { %v63_v13 = vpop.permute.xlu1 %62 }
 0x18e   :  { %v65_v14 = vadd.f32 %v63_v13, %v59_v12 }
 0x190   :  { %67 = vst.msk [vmem:[#allocation2] sm:$0xff] %vm40_vm0, %v65_v14 }
 0x197   :  { %v71_v15 = vld [vmem:[#allocation2] sm:$0xff] }
 0x198   :  { %v72_v16 = vsel %vm40_vm0, %v71_v15, 0.0 }
 0x199   :  { %73 = vadd.xlane.f32.xlu1 %v72_v16 }
 0x226   :  { %v74_v17 = vpop.xlane.xlu1 %73 }
 0x227   :  { %v75_v18 = vrot.slane %v74_v17, 4 }
 0x229   :  { %v76_v19 = vadd.f32 %v75_v18, %v74_v17 }
 0x22b   :  { %v77_v20 = vrot.slane %v76_v19, 2 }
 0x22d   :  { %v78_v21 = vadd.f32 %v77_v20, %v76_v19 }
 0x22f   :  { %v79_v22 = vrot.slane %v78_v21, 1 }
 0x231   :  { %v80_v23 = vadd.f32 %v79_v22, %v78_v21 }
 0x233   :  { %100 = vpush %v80_v23 }
 0x264   :  { %s101_s1 = spop %100 }
 0x265   :  { %s82_s6 = smul.f32 0.00390625, %s101_s1 }
 0x267   :  { %84 = sst [smem:[#allocation8]] %s82_s6 }
 0x268   :  { %165 = shalt.err (!%p162_p4)
}
 0x269   :  { %s177_s14 = smov [#allocation8]  }
 0x26a   :  { %92 = dma.smem_to_hbm %s177_s14, 16, %s234_s2, [#allocation5]  }
 0x26b   :  { %170 = dma.done.wait [#allocation5], 16  }
 0x26c   :  { %171 = vsyncadd [#allocation5], 4294967280 }
 0x26d   :  { %96 = sfence }
 0x26e   :  { %97 = vsyncpa [#allocation4], 1 }
 0x26f   :  { %98 = vsyncpa [#allocation7], 1 }
 0x270   :  { %99 = vsyncpa [#allocation5], 1 }

</bundles_post_ra>
